<compile_context>
chip_gen: v7x
topology: tpu7x:2x2x1
jax: 0.10.0
libtpu: 0.0.40
codegen_flags: <defaults>
</compile_context>

<pallas_src>
import jax
import jax.numpy as jnp
from jax.experimental import pallas as pl
from jax.experimental.pallas import tpu as pltpu


# ----------------------------- tiling parameters ----------------------------
_LANE_CANDIDATES = (512, 256, 128)     # lane-dense last dim (multiple of 128)
_TARGET_BLOCK_BYTES = 2 * 1024 * 1024  # ~2 MiB/block; in+out double-buffered
                                       # => ~8 MiB VMEM on all generations.


def _pick_lanes(n):
    """Largest lane width (multiple of 128) that exactly divides n, else None."""
    for lanes in _LANE_CANDIDATES:
        if n % lanes == 0:
            return lanes
    return None


def _pick_row_block(rows, lanes, dtype):
    """Rows per tile: ~2 MiB blocks, sublane-aligned, and >= ~4 grid steps for
    medium tensors so both v7x TensorCores stay busy."""
    itemsize = jnp.dtype(dtype).itemsize
    # Sublane granularity of the packed native tile: 8 (32-bit), 16 (bf16), 32 (8-bit).
    min_rows = 8 * max(1, 4 // max(1, itemsize))
    if rows <= min_rows:
        return rows                     # single block == full dim (always legal)
    target = max(min_rows,
                 (_TARGET_BLOCK_BYTES // (lanes * itemsize)) // min_rows * min_rows)
    quarter = max(min_rows, (rows // 4) // min_rows * min_rows)
    return min(target, quarter)


# ------------------------------- Pallas kernel -------------------------------
def _neg_scale_kernel(coeff_ref, g_ref, o_ref):
    # Backward of MyGradientReverseLayer: o = -coeff * g.
    # Negate + cast the SMEM scalar once, multiply in the gradient's own dtype
    # (native bf16 VPU lanes on v6e/v7x; Mosaic widens on v5e).
    neg_coeff = (-coeff_ref[0]).astype(o_ref.dtype)
    o_ref[...] = neg_coeff * g_ref[...]


def _neg_scale_pallas(coeff, g2d, row_block):
    rows, lanes = g2d.shape
    grid = (pl.cdiv(rows, row_block),)   # ragged trailing block handled by Pallas
    nbytes = g2d.size * jnp.dtype(g2d.dtype).itemsize
    return pl.pallas_call(
        _neg_scale_kernel,
        out_shape=jax.ShapeDtypeStruct((rows, lanes), g2d.dtype),
        grid_spec=pltpu.PrefetchScalarGridSpec(
            num_scalar_prefetch=0,
            grid=grid,
            in_specs=[
                pl.BlockSpec(memory_space=pltpu.SMEM),               # coeff (f32)
                pl.BlockSpec((row_block, lanes), lambda i: (i, 0)),  # grad tile
            ],
            out_specs=pl.BlockSpec((row_block, lanes), lambda i: (i, 0)),
        ),
        compiler_params=pltpu.CompilerParams(
            # Row blocks are independent: lets multi-TensorCore chips (v7x)
            # split the grid; default double-buffered pipelining elsewhere.
            dimension_semantics=("parallel",),
        ),
        cost_estimate=pl.CostEstimate(
            flops=g2d.size, transcendentals=0, bytes_accessed=2 * nbytes + 4),
    )(jnp.asarray(coeff, jnp.float32).reshape(1), g2d)


def _neg_scale(coeff, g):
    """-coeff * g with minimal HBM traffic (exactly 1 read + 1 write)."""
    n = g.size
    lanes = _pick_lanes(n)
    if lanes is None:
        # Unaligned (e.g. H*W = 49) or tiny gradient: a plain fused XLA
        # pointwise scale is already at the HBM roofline and avoids any
        # pad/slice copies an opaque kernel would need here.
        return (-coeff).astype(g.dtype) * g
    rows = n // lanes
    row_block = _pick_row_block(rows, lanes, g.dtype)
    g2d = g.reshape(rows, lanes)         # zero-copy reshape of contiguous data
    out2d = _neg_scale_pallas(coeff, g2d, row_block)
    return out2d.reshape(g.shape)        # zero-copy reshape back


# --------------------- Gradient-reverse op with custom VJP -------------------
@jax.custom_vjp
def _gradient_reverse(coeff, x):
    # Forward: identity (view_as).  No kernel, no copy.
    return x


def _grl_fwd(coeff, x):
    return x, coeff


def _grl_bwd(coeff, g):
    # coeff == 0 regime (first 25k steps): hoisted above all reshaping so the
    # whole backward is a single HBM write of zeros in the original shape.
    gx = jax.lax.cond(
        jnp.equal(coeff, jnp.float32(0.0)),
        lambda: jnp.zeros_like(g),
        lambda: _neg_scale(coeff, g),
    )
    # coeff gets a zero cotangent (PyTorch returns None for it).
    return (jnp.zeros_like(coeff), gx)


_gradient_reverse.defvjp(_grl_fwd, _grl_bwd)


def gradient_reverse(coeff, x):
    """coeff is a traced float32 scalar: one compiled executable covers every
    value the scheduler produces (no per-step recompiles)."""
    return _gradient_reverse(jnp.asarray(coeff, jnp.float32), x)


# ------------------------- Module-like Python wrapper ------------------------
class MyGradientReverseModuleJAX:
    """Mirrors MyGradientReverseModule: scheduler-driven coeff, identity fwd,
    gradient reversal (-coeff * g) in the backward pass."""

    def __init__(self, scheduler):
        self.scheduler = scheduler
        self.global_step = 0.0  # buffer torch.zeros(1)
        self.coeff = 0.0
        self.training = True

    def __call__(self, x):
        if self.global_step < 25000:
            self.coeff = 0.0
        else:
            self.coeff = float(self.scheduler(self.global_step - 25000))
        if self.training:
            self.global_step += 1.0
        return gradient_reverse(self.coeff, x)


# ------------------------------------ main -----------------------------------
if __name__ == "__main__":
    key = jax.random.PRNGKey(0)
    # Small NCHW input consistent with a conv-style feature map.
    x = jax.random.normal(key, (2, 4, 16, 16), dtype=jnp.float32)

    # aToBScheduler-style schedule (gamma=10, max_iter=10000), defined in-script.
    def scheduler(step, a=0.0, b=1.0, gamma=10.0, max_iter=10000.0):
        p = min(step / max_iter, 1.0)
        return float(2.0 * (b - a) / (1.0 + jnp.exp(-gamma * p)) - (b - a) + a)

    grl = MyGradientReverseModuleJAX(scheduler)

    # Forward: identity, no copy kernel.
    y = jax.block_until_ready(grl(x))
    assert y.shape == x.shape and y.dtype == x.dtype
    assert bool(jnp.allclose(y, x)), "forward must be identity"

    # Backward: -coeff * g.  coeff is a traced argument, so one jitted
    # executable serves every schedule value for a given gradient shape.
    loss_grad = jax.jit(
        jax.grad(lambda c, xx: jnp.sum(gradient_reverse(c, xx)), argnums=1))

    g1 = jax.block_until_ready(loss_grad(jnp.float32(0.5), x))
    assert bool(jnp.allclose(g1, -0.5)), "grad should be -coeff"

    g0 = jax.block_until_ready(loss_grad(jnp.float32(0.0), x))  # zero fast path
    assert bool(jnp.allclose(g0, 0.0)), "grad should be 0 when coeff == 0"

    # Non-128-aligned conv shape (H*W = 49): fused plain-XLA fallback path.
    x2 = jax.random.normal(jax.random.PRNGKey(1), (2, 3, 7, 7), dtype=jnp.float32)
    g2 = jax.block_until_ready(loss_grad(jnp.float32(0.25), x2))
    assert bool(jnp.allclose(g2, -0.25)), "grad should be -coeff on unaligned shapes"

    # 128-aligned shape whose row count (20) is not a multiple of the row block
    # (8): exercises the multi-step grid with a partial trailing block.
    x3 = jax.random.normal(jax.random.PRNGKey(2), (5, 8, 16, 16), dtype=jnp.float32)
    g3 = jax.block_until_ready(loss_grad(jnp.float32(1.5), x3))
    assert bool(jnp.allclose(g3, -1.5)), "grad should be -coeff with ragged grid"

    # bf16 gradient: kernel multiplies natively in bf16 (v6e/v7x VPU lanes).
    x4 = jax.random.normal(jax.random.PRNGKey(3), (4, 8, 16, 16), dtype=jnp.bfloat16)
    g4 = jax.block_until_ready(loss_grad(jnp.float32(0.75), x4))
    assert bool(jnp.allclose(g4.astype(jnp.float32), -0.75)), "bf16 grad mismatch"

    print("KERNEL_OK")
</pallas_src>

<mosaic_0001>
module attributes {stable_mosaic.version = 11 : i64} {
  func.func @_neg_scale_kernel(%arg0: i32, %arg1: memref<1xf32, #tpu.memory_space<smem>>, %arg2: memref<4x512xf32, #tpu.memory_space<vmem>>, %arg3: memref<4x512xf32, #tpu.memory_space<vmem>>) attributes {dimension_semantics = [#tpu.dimension_semantics<parallel>], iteration_bounds = array<i64: 1>, scalar_prefetch = 0 : i64, scratch_operands = 0 : i64, tpu.core_type = #tpu.core_type<tc>, window_params = [{transform_indices = @transform_0, window_bounds = array<i64: 1>}, {transform_indices = @transform_1, window_bounds = array<i64: 4, 512>}, {transform_indices = @transform_2, window_bounds = array<i64: 4, 512>}]} {
    %c0 = arith.constant 0 : index
    %0 = memref.load %arg1[%c0] : memref<1xf32, #tpu.memory_space<smem>>
    %cst = arith.constant 0.000000e+00 : f32
    %1 = arith.subf %cst, %0 : f32
    %c0_0 = arith.constant 0 : index
    %c0_1 = arith.constant 0 : index
    %2 = vector.load %arg2[%c0_0, %c0_1] : memref<4x512xf32, #tpu.memory_space<vmem>>, vector<4x512xf32>
    %3 = vector.broadcast %1 : f32 to vector<4x512xf32>
    %4 = arith.mulf %3, %2 : vector<4x512xf32>
    %c0_2 = arith.constant 0 : index
    %c0_3 = arith.constant 0 : index
    %5 = vector.load %arg3[%c0_2, %c0_3] : memref<4x512xf32, #tpu.memory_space<vmem>>, vector<4x512xf32>
    tpu.vector_store %arg3[%c0_2, %c0_3], %4 {strides = array<i32>} : memref<4x512xf32, #tpu.memory_space<vmem>>, vector<4x512xf32>,
    return
  }
  func.func @transform_0(%arg0: i32) -> i32 {
    %c0_i32 = arith.constant 0 : i32
    %c0_i32_0 = arith.constant 0 : i32
    return %c0_i32 : i32
  }
  func.func @transform_1(%arg0: i32) -> (i32, i32) {
    %c0_i32 = arith.constant 0 : i32
    %c0_i32_0 = arith.constant 0 : i32
    return %arg0, %c0_i32 : i32, i32
  }
  func.func @transform_2(%arg0: i32) -> (i32, i32) {
    %c0_i32 = arith.constant 0 : i32
    %c0_i32_0 = arith.constant 0 : i32
    return %arg0, %c0_i32 : i32, i32
  }
}

</mosaic_0001>

<bundles_post_ra>
// kernel: branch_0_fun.1
= control target key start
LH: loop header
LB: loop body
LE: loop exit
PB: predicated region body
PF: predicated region fallthrough
CT: control target
= control target key end

     0   :  { %s55_s0 = inlined_call_operand.<no memory space> [shape: f32[1], index: 0, kind: input, shape index: {}]   ;;  %s56_s1 = inlined_call_operand.vmem [shape: f32[4,512], index: 1, kind: input, shape index: {}]   ;;  %s57_s2 = inlined_call_operand.vmem [shape: f32[4,512], index: 2, kind: output, shape index: {}]  }
   0x1   :  { %s13_s11 = ssub.f32 0.0, %s55_s0  ;;  %v14_v0 = vld [vmem:[%s56_s1] sm:$0xff]  ;;  %v15_v1 = vld [vmem:[%s56_s1 + $0x8] sm:$0xff] }
   0x3   :  { %v16_v2 = vstv %s13_s11 }
   0x4   :  { %v17_v3 = vmul.f32 %v16_v2, %v14_v0  ;;  %v18_v4 = vmul.f32 %v16_v2, %v15_v1 }
   0x6   :  { %19 = vst [vmem:[%s57_s2] sm:$0xff] %v17_v3  ;;  %20 = vst [vmem:[%s57_s2 + $0x8] sm:$0xff] %v18_v4 }

</bundles_post_ra>
